<compile_context>
chip_gen: v6e
topology: v6e:2x2x1
jax: 0.10.0
libtpu: 0.0.40
codegen_flags: <defaults>
</compile_context>

<pallas_src>
import math

import jax
import jax.numpy as jnp
from jax.experimental import pallas as pl
from jax.experimental.pallas import tpu as pltpu

_LANE = 128
_VMEM_LIMIT = 32 * 1024 * 1024          # safe on v5e/v6e/v7x
_RESIDENT_SUPPORT_BYTES = 8 * 1024 * 1024
_STAGE1_BUDGET = 24 * 1024 * 1024


def _round_up(x, m):
    return ((x + m - 1) // m) * m


def _largest_dividing_tile(n, candidates):
    for c in candidates:
        if c <= n and n % c == 0:
            return c
    return n


# --------------------------------------------------------------------------
# Stage 1: support = X @ W   (f32 inputs, f32 MXU accumulation, bf16 output)
# --------------------------------------------------------------------------
def _support_kernel(x_ref, w_ref, out_ref):
    out_ref[...] = jnp.dot(
        x_ref[...], w_ref[...], preferred_element_type=jnp.float32
    ).astype(out_ref.dtype)


def compute_support(x_pad, w_pad, *, tile_m, tile_o, out_dtype):
    n_pad, in_pad = x_pad.shape
    out_pad = w_pad.shape[1]
    out_itemsize = jnp.dtype(out_dtype).itemsize
    cost = pl.CostEstimate(
        flops=2 * n_pad * in_pad * out_pad,
        transcendentals=0,
        bytes_accessed=(4 * n_pad * in_pad
                        + 4 * in_pad * out_pad * (n_pad // tile_m)
                        + out_itemsize * n_pad * out_pad),
    )
    return pl.pallas_call(
        _support_kernel,
        out_shape=jax.ShapeDtypeStruct((n_pad, out_pad), out_dtype),
        grid_spec=pltpu.PrefetchScalarGridSpec(
            num_scalar_prefetch=0,
            grid=(n_pad // tile_m, out_pad // tile_o),
            in_specs=[
                pl.BlockSpec((tile_m, in_pad), lambda i, j: (i, 0)),
                pl.BlockSpec((in_pad, tile_o), lambda i, j: (0, j)),
            ],
            out_specs=pl.BlockSpec((tile_m, tile_o), lambda i, j: (i, j)),
        ),
        compiler_params=pltpu.CompilerParams(
            dimension_semantics=("parallel", "parallel"),
            vmem_limit_bytes=_VMEM_LIMIT,
        ),
        cost_estimate=cost,
    )(x_pad, w_pad)


# --------------------------------------------------------------------------
# Stage 2: output = adj @ support + bias   (k-blocked, accumulate into out_ref)
# --------------------------------------------------------------------------
def _make_aggregate_kernel(tile_k, resident):
    def kernel(adj_ref, s_ref, b_ref, out_ref):
        k = pl.program_id(1)

        @pl.when(k == 0)
        def _():
            out_ref[...] = jnp.zeros_like(out_ref)

        if resident:
            # Whole support lives in VMEM (DMA'd once); slice the k-tile.
            start = pl.multiple_of(k * tile_k, tile_k)
            s_tile = s_ref[pl.ds(start, tile_k), :]
        else:
            s_tile = s_ref[...]

        # bf16 x bf16 -> f32 accumulation directly in the resident output tile.
        out_ref[...] += jnp.dot(
            adj_ref[...], s_tile, preferred_element_type=jnp.float32
        )

        @pl.when(k == pl.num_programs(1) - 1)
        def _():
            out_ref[...] += b_ref[...]

    return kernel


def aggregate(adj_lo, support, bias_2d, *, tile_n, tile_k, resident):
    n_pad = adj_lo.shape[0]
    out_pad = support.shape[1]
    adj_item = jnp.dtype(adj_lo.dtype).itemsize
    s_item = jnp.dtype(support.dtype).itemsize
    support_reads = 1 if resident else (n_pad // tile_n)
    cost = pl.CostEstimate(
        flops=2 * n_pad * n_pad * out_pad,
        transcendentals=0,
        bytes_accessed=(adj_item * n_pad * n_pad
                        + s_item * n_pad * out_pad * support_reads
                        + 4 * n_pad * out_pad
                        + 4 * out_pad),
    )

    if resident:
        s_spec = pl.BlockSpec((n_pad, out_pad), lambda i, k: (0, 0))
    else:
        s_spec = pl.BlockSpec((tile_k, out_pad), lambda i, k: (k, 0))

    return pl.pallas_call(
        _make_aggregate_kernel(tile_k, resident),
        out_shape=jax.ShapeDtypeStruct((n_pad, out_pad), jnp.float32),
        grid_spec=pltpu.PrefetchScalarGridSpec(
            num_scalar_prefetch=0,
            grid=(n_pad // tile_n, n_pad // tile_k),
            in_specs=[
                # adj tile streams over both grid axes (bf16).
                pl.BlockSpec((tile_n, tile_k), lambda i, k: (i, k)),
                s_spec,
                # tiny invariant bias row.
                pl.BlockSpec((1, out_pad), lambda i, k: (0, 0)),
            ],
            out_specs=pl.BlockSpec((tile_n, out_pad), lambda i, k: (i, 0)),
        ),
        compiler_params=pltpu.CompilerParams(
            # Row axis shards across TensorCores; reduction axis is serial.
            dimension_semantics=("parallel", "arbitrary"),
            vmem_limit_bytes=_VMEM_LIMIT,
        ),
        cost_estimate=cost,
    )(adj_lo, support, bias_2d)


# --------------------------------------------------------------------------
# Public wrapper matching GraphConvolution.forward(input, adj)
# --------------------------------------------------------------------------
def graph_convolution(x, adj, weight, bias=None, *, stream_dtype=jnp.bfloat16):
    """GCN forward: adj @ (x @ weight) + bias (bias optional)."""
    n, in_dim = x.shape
    in_dim_w, out_dim = weight.shape
    assert in_dim == in_dim_w
    assert adj.shape == (n, n)

    # Pad every dim to a multiple of 128: lane-dense stores, aligned blocks,
    # and no "tile = full N" fallback for awkward node counts.
    n_pad = _round_up(n, _LANE)
    in_pad = _round_up(in_dim, _LANE)
    out_pad = _round_up(out_dim, _LANE)

    x_pad = jnp.pad(x.astype(jnp.float32),
                    ((0, n_pad - n), (0, in_pad - in_dim)))
    w_pad = jnp.pad(weight.astype(jnp.float32),
                    ((0, in_pad - in_dim), (0, out_pad - out_dim)))
    adj_pad = jnp.pad(adj.astype(jnp.float32),
                      ((0, n_pad - n), (0, n_pad - n))).astype(stream_dtype)

    if bias is None:
        bias_pad = jnp.zeros((1, out_pad), jnp.float32)
    else:
        bias_pad = jnp.pad(bias.astype(jnp.float32),
                           (0, out_pad - out_dim)).reshape(1, out_pad)

    # ---- tile selection -------------------------------------------------
    # Row tile: small (128/256) so acc/out footprint stays small and there are
    # >= 2 row tiles whenever possible (both v7x TensorCores get work).
    tile_rows = 256 if (n_pad % 256 == 0 and n_pad >= 1024) else 128
    tile_rows = min(tile_rows, n_pad)

    # Stage-1 output-feature tile (W column tile).
    tile_o = _largest_dividing_tile(out_pad, (256, 128))
    tile_m = tile_rows
    # Shrink stage-1 tiles if resident X/W slabs would blow the VMEM budget.
    while tile_o > 128 and 2 * in_pad * (tile_m + tile_o) * 4 > _STAGE1_BUDGET:
        tile_o //= 2
    while tile_m > 128 and 2 * in_pad * (tile_m + tile_o) * 4 > _STAGE1_BUDGET:
        tile_m //= 2

    # Stage-2 reduction tile: long k for contiguous adj DMA bursts.
    tile_k = _largest_dividing_tile(n_pad, (2048, 1024, 512, 256, 128))

    # Support residency decision (bf16 footprint).
    stream_item = jnp.dtype(stream_dtype).itemsize
    support_bytes = n_pad * out_pad * stream_item
    resident = support_bytes <= _RESIDENT_SUPPORT_BYTES
    if not resident:
        # Streamed support: cap its double-buffer at ~4 MiB.
        while tile_k > 128 and 2 * tile_k * out_pad * stream_item > 4 * 1024 * 1024:
            tile_k //= 2

    # ---- launch ----------------------------------------------------------
    support = compute_support(x_pad, w_pad, tile_m=tile_m, tile_o=tile_o,
                              out_dtype=stream_dtype)
    out_full = aggregate(adj_pad, support, bias_pad,
                         tile_n=tile_rows, tile_k=tile_k, resident=resident)
    return out_full[:n, :out_dim]


def init_params(key, in_dim, out_dim):
    """Matches reset_parameters: U(-stdv, stdv), stdv = 1/sqrt(out_dim)."""
    stdv = 1.0 / math.sqrt(out_dim)
    kw, kb = jax.random.split(key)
    weight = jax.random.uniform(kw, (in_dim, out_dim), jnp.float32, -stdv, stdv)
    bias = jax.random.uniform(kb, (out_dim,), jnp.float32, -stdv, stdv)
    return weight, bias


if __name__ == "__main__":
    key = jax.random.PRNGKey(0)
    k_x, k_adj, k_p = jax.random.split(key, 3)

    # Deliberately non-128-aligned sizes to exercise the padding path.
    N, in_dim, out_dim = 200, 48, 96

    x = jax.random.normal(k_x, (N, in_dim), jnp.float32)

    # Deterministic row-normalized dense "adjacency" (stand-in for sparse adj).
    raw = jax.random.uniform(k_adj, (N, N), jnp.float32)
    adj = jnp.where(raw > 0.9, raw, 0.0) + jnp.eye(N, dtype=jnp.float32)
    adj = adj / jnp.sum(adj, axis=1, keepdims=True)

    weight, bias = init_params(k_p, in_dim, out_dim)

    out = graph_convolution(x, adj, weight, bias)
    out = jax.block_until_ready(out)
    assert out.shape == (N, out_dim)

    # Reference matched to the kernel's bf16 streaming (f32 accumulation).
    support_ref = (x @ weight).astype(jnp.bfloat16).astype(jnp.float32)
    adj_ref = adj.astype(jnp.bfloat16).astype(jnp.float32)
    ref = adj_ref @ support_ref + bias[None, :]
    assert jnp.allclose(out, ref, atol=2e-3, rtol=2e-3), "mismatch vs bf16-matched ref"

    # Loose sanity check against the pure-f32 reference.
    ref_f32 = adj @ (x @ weight) + bias[None, :]
    assert jnp.allclose(out, ref_f32, atol=5e-2, rtol=5e-2), "mismatch vs f32 ref"

    print("KERNEL_OK")
</pallas_src>

<mosaic_0001>
module attributes {stable_mosaic.version = 11 : i64} {
  func.func @_support_kernel(%arg0: i32, %arg1: i32, %arg2: memref<128x128xf32, #tpu.memory_space<vmem>>, %arg3: memref<128x128xf32, #tpu.memory_space<vmem>>, %arg4: memref<128x128xbf16, #tpu.memory_space<vmem>>) attributes {dimension_semantics = [#tpu.dimension_semantics<parallel>, #tpu.dimension_semantics<parallel>], iteration_bounds = array<i64: 2, 1>, scalar_prefetch = 0 : i64, scratch_operands = 0 : i64, tpu.core_type = #tpu.core_type<tc>, window_params = [{transform_indices = @transform_0, window_bounds = array<i64: 128, 128>}, {transform_indices = @transform_1, window_bounds = array<i64: 128, 128>}, {transform_indices = @transform_2, window_bounds = array<i64: 128, 128>}]} {
    %c0 = arith.constant 0 : index
    %c0_0 = arith.constant 0 : index
    %0 = vector.load %arg2[%c0, %c0_0] : memref<128x128xf32, #tpu.memory_space<vmem>>, vector<128x128xf32>
    %c0_1 = arith.constant 0 : index
    %c0_2 = arith.constant 0 : index
    %1 = vector.load %arg3[%c0_1, %c0_2] : memref<128x128xf32, #tpu.memory_space<vmem>>, vector<128x128xf32>
    %cst = arith.constant dense<0.000000e+00> : vector<128x128xf32>
    %2 = tpu.matmul %0, %1, %cst {dimension_numbers = #tpu.dot_dimension_numbers<[1], [0], [0], [1], [0, 0, 1, 1], [], []>} : vector<128x128xf32>, vector<128x128xf32>, vector<128x128xf32> -> vector<128x128xf32>
    %3 = arith.truncf %2 : vector<128x128xf32> to vector<128x128xbf16>
    %c0_3 = arith.constant 0 : index
    %c0_4 = arith.constant 0 : index
    %4 = vector.load %arg4[%c0_3, %c0_4] : memref<128x128xbf16, #tpu.memory_space<vmem>>, vector<128x128xbf16>
    tpu.vector_store %arg4[%c0_3, %c0_4], %3 {strides = array<i32>} : memref<128x128xbf16, #tpu.memory_space<vmem>>, vector<128x128xbf16>,
    return
  }
  func.func @transform_0(%arg0: i32, %arg1: i32) -> (i32, i32) {
    %c0_i32 = arith.constant 0 : i32
    %c0_i32_0 = arith.constant 0 : i32
    return %arg0, %c0_i32 : i32, i32
  }
  func.func @transform_1(%arg0: i32, %arg1: i32) -> (i32, i32) {
    %c0_i32 = arith.constant 0 : i32
    %c0_i32_0 = arith.constant 0 : i32
    return %c0_i32, %arg1 : i32, i32
  }
  func.func @transform_2(%arg0: i32, %arg1: i32) -> (i32, i32) {
    %c0_i32 = arith.constant 0 : i32
    return %arg0, %arg1 : i32, i32
  }
}

</mosaic_0001>

<bundles_post_ra>
// kernel: tpu_custom_call.1
= control target key start
LH: loop header
LB: loop body
LE: loop exit
PB: predicated region body
PF: predicated region fallthrough
CT: control target
= control target key end

     0   :  { %7 = vsyncpa [#allocation3], 0  ;;  %s1230_s0 = inlined_call_operand.hbm [shape: f32[256,128], index: 0, kind: input, shape index: {}]   ;;  %s1231_s1 = inlined_call_operand.hbm [shape: f32[128,128], index: 1, kind: input, shape index: {}]   ;;  %s1232_s2 = inlined_call_operand.hbm [shape: bf16[256,128], index: 2, kind: output, shape index: {}]  }
   0x1   :  { %9 = vsyncpa [#allocation3 + $0x1], 0 }
   0x2   :  { %10 = vsyncpa [#allocation6], 0 }
   0x3   :  { %11 = vsyncpa [#allocation4], 0 }
   0x4   :  { %13 = vsyncpa [#allocation4 + $0x1], 0  ;;  %s1024_s9 = smov 0   ;;  %s1026_s10 = smov 0  }
   0x5   :  { %s1028_s11 = smov 0   ;;  %s1030_s12 = smov 0  }
   0x6   :  { %s1032_s13 = smov 0   ;;  %s1034_s14 = smov 0  }
   0x7 LB: > { %s567_s15 = sadd.s32 4294967295, %s1000_s14   ;;  %s568_s16 = sadd.s32 4294967294, %s1000_s14   ;;  %s1000_s14 = sphi %s1034_s14, %s19_s14   ;;  %s996_s13 = sphi %s1032_s13, %s1252_s13   ;;  %s992_s12 = sphi %s1030_s12, %s1251_s12   ;;  %s988_s11 = sphi %s1028_s11, %s1250_s11   ;;  %s984_s10 = sphi %s1026_s10, %s1249_s10   ;;  %s980_s9 = sphi %s1024_s9, %s1248_s9  }
   0x8   : > { %p51_p0 = scmp.ne.s32.totalorder %s984_s10, %s980_s9  ;;  %p1058_p1 = scmp.eq.s32.totalorder %s567_s15, 0 }
   0x9   : > { %p1062_p2 = scmp.eq.s32.totalorder %s567_s15, 1  ;;  %p109_p3 = scmp.eq.s32.totalorder %s568_s16, 1 }
   0xa   : > { %p1068_p4 = por %p1058_p1, %p51_p0  ;;  %p569_p5 = scmp.ge.s32.totalorder %s1000_s14, 1 }
   0xb   : > { %p1073_p6 = por %p109_p3, %p51_p0  ;;  %p116_p7 = scmp.lt.s32.totalorder %s1000_s14, 3 }
   0xc   : > { %s1237_s19 = scalar_select %p1068_p4, 1, 0 }
   0xd   : > { %s1238_s20 = scalar_select %p1073_p6, 1, 0 }
   0xe   : > { %p1078_p8 = pnand %p569_p5, %p116_p7  ;;  %s1002_s22 = smov [#allocation5]  }
   0xf   : > { %s130_s23 = sshll.u32 %s1002_s22, 4  ;;  %s31_s25 = sadd.s32 1, %s996_s13  ;;  %s131_s23 = int_to_ptr.vmem [resolvable:$true] %s130_s23 }
  0x10   : > { %p793_p9 = pneg %p1078_p8  ;;  %s873_s26 = scalar_lea.vmem %s131_s23, 2048 }
  0x11   : > { %p874_p13 = scmp.ne.s32.totalorder %s131_s23, %s873_s26  ;;  %p881_p5 = scmp.lt.s32.totalorder %s131_s23, %s131_s23 }
  0x12   : > { %p1087_p11 = pnand %p793_p9, %p1058_p1  ;;  %p882_p7 = scmp.lt.s32.totalorder %s873_s26, %s873_s26 }
  0x14   : > { %p864_p12 = pneg %p1087_p11  ;;  %p883_p6 = por %p882_p7, %p881_p5 }
  0x16   : > { %p876_p0 = pnand %p874_p13, %p864_p12 }
  0x18   : > { %p877_p3 = pneg %p876_p0 }
  0x1a   : > { %p884_p4 = pnand %p883_p6, %p877_p3 }
  0x1c   : > { %887 = shalt.err (!%p884_p4)
}
  0x1d   : > { %s1234_s27 = smov 128   ;;  %s1004_s28 = smov 8  }
  0x1e   : > { %796 = dma.hbm_to_vmem [thread:$0]  (!%p1087_p11), %s1231_s1, 2048, %s131_s23, [#allocation6], %s1234_s27, %s1234_s27, %s1004_s28  }
  0x1f   : > { %p33_p4 = scmp.ge.s32.totalorder %s31_s25, 2  ;;  %s38_s3 = sadd.s32 1, %s988_s11 }
  0x20   : > { %p45_p6 = scmp.ne.s32.totalorder %s988_s11, %s984_s10  ;;  %p46_p9 = scmp.eq.s32.totalorder %s1000_s14, 0 }
  0x21   : > { %s1254_s25 = smov (%p33_p4, %s31_s25), 0  ;;  %p806_p0 = scmp.lt.s32.totalorder %s1000_s14, 2 }
  0x22   : > { %p1108_p12 = por %p46_p9, %p45_p6  ;;  %p1114_p13 = por %p1062_p2, %p45_p6 }
  0x23   : > { %s35_s6 = ssub.s32 %s996_s13, %s1254_s25  ;;  %s144_s7 = sand.u32 1, %s988_s11  }
  0x24   : > { %p36_p11 = scmp.eq.s32.totalorder %s35_s6, 0  ;;  %s572_s8 = sshll.u32 %s144_s7, 7 }
  0x25   : > { %s600_s16 = sshll.u32 %s996_s13, 11  ;;  %s148_s26 = scalar_lea.vmem [#allocation2], %s572_s8 }
  0x26   : > { %s1123_s15 = scalar_select %p36_p11, %s988_s11, %s38_s3  }
  0x27   : > { %s154_s24 = scalar_lea.hbm %s1230_s0, %s600_s16  ;;  %s155_s29 = sshll.u32 %s148_s26, 4  ;;  %s156_s29 = int_to_ptr.vmem [resolvable:$true] %s155_s29 }
  0x28   : > { %p1131_p2 = pnand %p806_p0, %p1108_p12  ;;  %s145_s30 = scalar_lea.sflag [#allocation3], %s144_s7 }
  0x29   : > { %s901_s6 = scalar_lea.vmem %s156_s29, 2048  ;;  %s1005_s3 = smov [#allocation2]  }
  0x2a   : > { %p890_p3 = pneg %p1131_p2  ;;  %p902_p5 = scmp.ne.s32.totalorder %s156_s29, %s901_s6 }
  0x2b   : > { %s906_s27 = sshll.u32 %s1005_s3, 4  ;;  %s907_s27 = int_to_ptr.vmem [resolvable:$false] %s906_s27 }
  0x2c   : > { %p904_p7 = pnand %p902_p5, %p890_p3  ;;  %s908_s16 = scalar_lea.vmem %s907_s27, 4096 }
  0x2d   : > { %p909_p6 = scmp.lt.s32.totalorder %s156_s29, %s907_s27  ;;  %p910_p9 = scmp.lt.s32.totalorder %s908_s16, %s901_s6 }
  0x2e   : > { %p905_p4 = pneg %p904_p7 }
  0x2f   : > { %p911_p11 = por %p910_p9, %p909_p6 }
  0x31   : > { %p912_p10 = pnand %p911_p11, %p905_p4 }
  0x33   : > { %915 = shalt.err (!%p912_p10)
}
  0x34   : > { %s1244_s4 = smov 128   ;;  %167 = sbr.rel (%p1078_p8) target bundleno = 317 (0x13d), region = 28 }
  0x35   : > { %800 = dma.hbm_to_vmem [thread:$0]  (!%p1131_p2), %s154_s24, 2048, %s156_s29, %s145_s30, %s1244_s4, %s1244_s4, %s1004_s28  }
  0x36   : > { %s1145_s7 = sand.u32 (!%p1078_p8), 1, %s984_s10   ;;  %p1245_p10 = scmp.ne.s32.totalorder (!%p1078_p8), %s1237_s19, 0 }
  0x37   : > { %s576_s27 = sshll.u32 (!%p1078_p8), %s1145_s7, 7  ;;  %s170_s8 = scalar_lea.sflag (!%p1078_p8), [#allocation3], %s1145_s7 }
  0x38   : > { %s1149_s22 = scalar_lea.vmem (!%p1078_p8), [#allocation2], %s576_s27 }
  0x39   : > { %967 = dma.done.wait (%p1245_p10), %s170_s8, 2048  }
  0x3a   : > { %969 = vsyncadd (%p1245_p10), %s170_s8, 4294965248 }
  0x3b   : > { %971 = dma.done.wait (%p1058_p1), [#allocation6], 2048  }
  0x3c   : > { %973 = vsyncadd (%p1058_p1), [#allocation6], 4294965248  ;;  %v231_v0 = vld [vmem:[#allocation5 + $0x78] sm:$0xff]  ;;  %v230_v1 = vld [vmem:[#allocation5 + $0x70] sm:$0xff]  ;;  %s578_s17 = sshll.u32 %s1145_s7, 6  ;;  %s617_s28 = sshll.u32 %s992_s12, 10 }
  0x3d   : > { %697 = vmatprep.subr.mxu0 %v231_v0  ;;  %753 = vmatprep.subr.mxu1 %v231_v0  ;;  %v229_v2 = vld [vmem:[#allocation5 + $0x68] sm:$0xff]  ;;  %v228_v3 = vld [vmem:[#allocation5 + $0x60] sm:$0xff]  ;;  %v227_v4 = vld [vmem:[#allocation5 + $0x58] sm:$0xff]  ;;  %s197_s19 = scalar_lea.vmem [#allocation7], %s578_s17  ;;  %s1182_s26 = scalar_lea.hbm %s1232_s2, %s617_s28 }
  0x3e   : > { %698 = vmatpush3.msra.mxu0 %v231_v0  ;;  %769 = vmatpush3.msra.mxu1 %v231_v0  ;;  %v226_v5 = vld [vmem:[#allocation5 + $0x50] sm:$0xff]  ;;  %v225_v6 = vld [vmem:[#allocation5 + $0x48] sm:$0xff]  ;;  %v224_v7 = vld [vmem:[#allocation5 + $0x40] sm:$0xff]  ;;  %s472_s21 = sshll.u32 %s197_s19, 4  ;;  %s458_s12 = scalar_lea.sflag [#allocation4], %s1145_s7  ;;  %s1177_s21 = int_to_ptr.vmem [resolvable:$true] %s472_s21 }
  0x3f   : > { %699 = vmatprep.subr.mxu0 %v230_v1  ;;  %754 = vmatprep.subr.mxu1 %v230_v1  ;;  %v223_v8 = vld [vmem:[#allocation5 + $0x38] sm:$0xff]  ;;  %v222_v9 = vld [vmem:[#allocation5 + $0x30] sm:$0xff]  ;;  %v221_v10 = vld [vmem:[#allocation5 + $0x28] sm:$0xff]  ;;  %s916_s29 = scalar_lea.vmem %s1177_s21, 1024  ;;  %s1006_s18 = smov [#allocation7]  }
  0x40   : > { %700 = vmatpush3.msra.mxu0 %v230_v1  ;;  %770 = vmatpush3.msra.mxu1 %v230_v1  ;;  %v220_v11 = vld [vmem:[#allocation5 + $0x20] sm:$0xff]  ;;  %v219_v12 = vld [vmem:[#allocation5 + $0x18] sm:$0xff]  ;;  %v218_v13 = vld [vmem:[#allocation5 + $0x10] sm:$0xff]  ;;  %p917_p1 = scmp.ne.s32.totalorder %s1177_s21, %s916_s29  ;;  %s920_s30 = sshll.u32 %s1006_s18, 4  ;;  %s921_s30 = int_to_ptr.vmem [resolvable:$false] %s920_s30 }
  0x41   : > { %701 = vmatprep.subr.mxu0 %v229_v2  ;;  %755 = vmatprep.subr.mxu1 %v229_v2  ;;  %v217_v14 = vld [vmem:[#allocation5 + $0x8] sm:$0xff]  ;;  %v216_v15 = vld [vmem:[#allocation5] sm:$0xff]  ;;  %v202_v20 = vld [vmem:[%s1149_s22 + $0x10] sm:$0xff]  ;;  %s922_s6 = scalar_lea.vmem %s921_s30, 2048  ;;  %p923_p0 = scmp.lt.s32.totalorder %s1177_s21, %s921_s30 }
  0x42   : > { %702 = vmatpush3.msra.mxu0 %v229_v2  ;;  %771 = vmatpush3.msra.mxu1 %v229_v2  ;;  %v200_v16 = vld [vmem:[%s1149_s22] sm:$0xff]  ;;  %v201_v18 = vld [vmem:[%s1149_s22 + $0x8] sm:$0xff]  ;;  %v210_v21 = vld [vmem:[%s1149_s22 + $0x50] sm:$0xff]  ;;  %p918_p8 = pnand %p917_p1, %p1114_p13  ;;  %p924_p2 = scmp.lt.s32.totalorder %s922_s6, %s916_s29 }
  0x43   : > { %703 = vmatprep.subr.mxu0 %v228_v3  ;;  %756 = vmatprep.subr.mxu1 %v228_v3  ;;  %v208_v17 = vld [vmem:[%s1149_s22 + $0x40] sm:$0xff]  ;;  %v209_v19 = vld [vmem:[%s1149_s22 + $0x48] sm:$0xff]  ;;  %v203_v22 = vld [vmem:[%s1149_s22 + $0x18] sm:$0xff] }
  0x44   : > { %704 = vmatpush3.msra.mxu0 %v228_v3  ;;  %772 = vmatpush3.msra.mxu1 %v228_v3  ;;  %v211_v23 = vld [vmem:[%s1149_s22 + $0x58] sm:$0xff]  ;;  %v204_v24 = vld [vmem:[%s1149_s22 + $0x20] sm:$0xff]  ;;  %v205_v26 = vld [vmem:[%s1149_s22 + $0x28] sm:$0xff]  ;;  %p919_p12 = pneg %p918_p8  ;;  %p925_p3 = por %p924_p2, %p923_p0 }
  0x45   : > { %705 = vmatprep.subr.mxu0 %v227_v4  ;;  %757 = vmatprep.subr.mxu1 %v227_v4  ;;  %v212_v25 = vld [vmem:[%s1149_s22 + $0x60] sm:$0xff]  ;;  %v213_v27 = vld [vmem:[%s1149_s22 + $0x68] sm:$0xff]  ;;  %v206_v28 = vld [vmem:[%s1149_s22 + $0x30] sm:$0xff] }
  0x46   : > { %706 = vmatpush3.msra.mxu0 %v227_v4  ;;  %773 = vmatpush3.msra.mxu1 %v227_v4  ;;  %v214_v29 = vld [vmem:[%s1149_s22 + $0x70] sm:$0xff]  ;;  %v207_v30 = vld [vmem:[%s1149_s22 + $0x38] sm:$0xff]  ;;  %p926_p5 = pnand %p925_p3, %p919_p12 }
  0x47   : > { %707 = vmatprep.subr.mxu0 %v226_v5  ;;  %758 = vmatprep.subr.mxu1 %v226_v5  ;;  %v215_v31 = vld [vmem:[%s1149_s22 + $0x78] sm:$0xff] }
  0x48   : > { %708 = vmatpush3.msra.mxu0 %v226_v5  ;;  %774 = vmatpush3.msra.mxu1 %v226_v5 }
  0x49   : > { %709 = vmatprep.subr.mxu0 %v225_v6  ;;  %759 = vmatprep.subr.mxu1 %v225_v6 }
  0x4a   : > { %710 = vmatpush3.msra.mxu0 %v225_v6  ;;  %775 = vmatpush3.msra.mxu1 %v225_v6 }
  0x4b   : > { %711 = vmatprep.subr.mxu0 %v224_v7  ;;  %760 = vmatprep.subr.mxu1 %v224_v7 }
  0x4c   : > { %712 = vmatpush3.msra.mxu0 %v224_v7  ;;  %776 = vmatpush3.msra.mxu1 %v224_v7 }
  0x4d   : > { %713 = vmatprep.subr.mxu0 %v223_v8  ;;  %761 = vmatprep.subr.mxu1 %v223_v8 }
  0x4e   : > { %714 = vmatpush3.msra.mxu0 %v223_v8  ;;  %777 = vmatpush3.msra.mxu1 %v223_v8 }
  0x4f   : > { %715 = vmatprep.subr.mxu0 %v222_v9  ;;  %762 = vmatprep.subr.mxu1 %v222_v9 }
  0x50   : > { %716 = vmatpush3.msra.mxu0 %v222_v9  ;;  %778 = vmatpush3.msra.mxu1 %v222_v9 }
  0x51   : > { %717 = vmatprep.subr.mxu0 %v221_v10  ;;  %763 = vmatprep.subr.mxu1 %v221_v10 }
  0x52   : > { %718 = vmatpush3.msra.mxu0 %v221_v10  ;;  %779 = vmatpush3.msra.mxu1 %v221_v10 }
  0x53   : > { %719 = vmatprep.subr.mxu0 %v220_v11  ;;  %764 = vmatprep.subr.mxu1 %v220_v11 }
  0x54   : > { %720 = vmatpush3.msra.mxu0 %v220_v11  ;;  %780 = vmatpush3.msra.mxu1 %v220_v11 }
  0x55   : > { %721 = vmatprep.subr.mxu0 %v219_v12  ;;  %765 = vmatprep.subr.mxu1 %v219_v12 }
  0x56   : > { %722 = vmatpush3.msra.mxu0 %v219_v12  ;;  %781 = vmatpush3.msra.mxu1 %v219_v12 }
  0x57   : > { %723 = vmatprep.subr.mxu0 %v218_v13  ;;  %766 = vmatprep.subr.mxu1 %v218_v13 }
  0x58   : > { %724 = vmatpush3.msra.mxu0 %v218_v13  ;;  %782 = vmatpush3.msra.mxu1 %v218_v13 }
  0x59   : > { %725 = vmatprep.subr.mxu0 %v217_v14  ;;  %767 = vmatprep.subr.mxu1 %v217_v14 }
  0x5a   : > { %726 = vmatpush3.msra.mxu0 %v217_v14  ;;  %783 = vmatpush3.msra.mxu1 %v217_v14 }
  0x5b   : > { %727 = vmatprep.subr.mxu0 %v216_v15  ;;  %768 = vmatprep.subr.mxu1 %v216_v15 }
  0x5c   : > { %728 = vmatpush3.msra.mxu0 %v216_v15  ;;  %784 = vmatpush3.msra.mxu1 %v216_v15 }
  0x5d   : > { %729 = vmatprep.mubr.f32.mxu0 %v200_v16  ;;  %741 = vmatprep.mubr.f32.mxu1 %v208_v17 }
  0x5e   : > { %730 = vmatmul.mubr.f32.vlgmr.msra.gmra.mxu0 %v201_v18  ;;  %742 = vmatmul.mubr.f32.vlgmr.msra.gmra.mxu1 %v209_v19 }
  0x5f   : > { %732 = vmatprep.mubr.f32.mxu0 %v202_v20  ;;  %744 = vmatprep.mubr.f32.mxu1 %v210_v21 }
  0x62   : > { %733 = vmatmul.mubr.f32.gmra.mxu0 %v203_v22  ;;  %745 = vmatmul.mubr.f32.gmra.mxu1 %v211_v23 }
  0x63   : > { %735 = vmatprep.mubr.f32.mxu0 %v204_v24  ;;  %747 = vmatprep.mubr.f32.mxu1 %v212_v25 }
  0x66   : > { %736 = vmatmul.mubr.f32.gmra.mxu0 %v205_v26  ;;  %748 = vmatmul.mubr.f32.gmra.mxu1 %v213_v27 }
  0x67   : > { %738 = vmatprep.mubr.f32.mxu0 %v206_v28  ;;  %750 = vmatprep.mubr.f32.mxu1 %v214_v29 }
  0x6a   : > { %739 = vmatmul.mubr.f32.gmra.mxu0 %v207_v30  ;;  %751 = vmatmul.mubr.f32.gmra.mxu1 %v215_v31 }
 0x11e   : > { %v731_v32 = vpop.f32.mrf.mxu0  ;;  %v743_v33 = vpop.f32.mrf.mxu1 }
 0x120   : > { %v298_v34 = vpop.f32.mrf.mxu0  ;;  %v338_v35 = vpop.f32.mrf.mxu1 }
 0x121   : > { %v621_v36 = vpack.c.bf16 %v731_v32, %v298_v34  ;;  %v641_v37 = vpack.c.bf16 %v743_v33, %v338_v35 }
 0x122   : > { %v734_v38 = vpop.f32.mrf.mxu0  ;;  %v746_v39 = vpop.f32.mrf.mxu1 }
 0x123   : > { %622 = vst [vmem:[%s197_s19] sm:$0xff] %v621_v36   ;;  %661 = vst [vmem:[%s197_s19 + $0x20] sm:$0xff] %v641_v37  }
 0x124   : > { %v308_v40 = vpop.f32.mrf.mxu0  ;;  %v348_v41 = vpop.f32.mrf.mxu1 }
 0x125   : > { %v626_v42 = vpack.c.bf16 %v734_v38, %v308_v40  ;;  %v646_v43 = vpack.c.bf16 %v746_v39, %v348_v41 }
 0x126   : > { %v737_v44 = vpop.f32.mrf.mxu0  ;;  %v749_v45 = vpop.f32.mrf.mxu1 }
 0x127   : > { %658 = vst [vmem:[%s197_s19 + $0x8] sm:$0xff] %v626_v42   ;;  %662 = vst [vmem:[%s197_s19 + $0x28] sm:$0xff] %v646_v43  }
 0x128   : > { %v318_v46 = vpop.f32.mrf.mxu0  ;;  %v358_v47 = vpop.f32.mrf.mxu1 }
 0x129   : > { %v631_v48 = vpack.c.bf16 %v737_v44, %v318_v46  ;;  %v651_v49 = vpack.c.bf16 %v749_v45, %v358_v47 }
 0x12a   : > { %v740_v50 = vpop.f32.mrf.mxu0  ;;  %v752_v51 = vpop.f32.mrf.mxu1 }
 0x12b   : > { %659 = vst [vmem:[%s197_s19 + $0x10] sm:$0xff] %v631_v48   ;;  %663 = vst [vmem:[%s197_s19 + $0x30] sm:$0xff] %v651_v49  }
 0x12c   : > { %v328_v52 = vpop.f32.mrf.mxu0  ;;  %v368_v53 = vpop.f32.mrf.mxu1 }
 0x12d   : > { %v636_v54 = vpack.c.bf16 %v740_v50, %v328_v52  ;;  %v656_v55 = vpack.c.bf16 %v752_v51, %v368_v53 }
 0x12f   : > { %660 = vst [vmem:[%s197_s19 + $0x18] sm:$0xff] %v636_v54   ;;  %664 = vst [vmem:[%s197_s19 + $0x38] sm:$0xff] %v656_v55  }
 0x130   : > { %929 = shalt.err (!%p926_p5)
}
 0x131   : > { %s930_s3 = scalar_lea.hbm %s1182_s26, 1024  ;;  %s934_s27 = scalar_lea.hbm %s1232_s2, 2048 }
 0x132   : > { %p931_p7 = scmp.ne.s32.totalorder %s1182_s26, %s930_s3  ;;  %p935_p9 = scmp.lt.s32.totalorder %s1182_s26, %s1232_s2 }
 0x133   : > { %p936_p11 = scmp.lt.s32.totalorder %s934_s27, %s930_s3 }
 0x134   : > { %p932_p4 = pnand %p931_p7, %p1114_p13 }
 0x135   : > { %p937_p10 = por %p936_p11, %p935_p9 }
 0x136   : > { %p933_p6 = pneg %p932_p4 }
 0x138   : > { %p938_p1 = pnand %p937_p10, %p933_p6 }
 0x13a   : > { %941 = shalt.err (!%p938_p1)
}
 0x13b   : > { %s1007_s17 = smov 64   ;;  %s1008_s19 = smov 4  }
 0x13c   : > { %791 = dma.vmem_to_hbm [thread:$0]  (%p1114_p13), %s1177_s21, 1024, %s1182_s26, %s458_s12, %s1007_s17, %s1007_s17, %s1008_s19  }
 0x13d PF: > { %s487_s28 = sand.u32 1, %s980_s9   ;;  %p1246_p8 = scmp.ne.s32.totalorder %s1238_s20, 0 }
 0x13e   : > { %p1247_p12 = scmp.ge.s32.totalorder %s1000_s14, 2  ;;  %s488_s23 = scalar_lea.sflag [#allocation4], %s487_s28 }
 0x140   : > { %p802_p0 = pnand %p1247_p12, %p1246_p8 }
 0x142   : > { %p803_p2 = pneg %p802_p0 }
 0x144   : > { %975 = dma.done.wait (%p803_p2), %s488_s23, 1024  }
 0x145   : > { %977 = vsyncadd (%p803_p2), %s488_s23, 4294966272  ;;  %s19_s14 = sadd.s32 1, %s1000_s14   ;;  %s1248_s9 = smov %s984_s10 }
 0x146   : > { %p16_p3 = scmp.ge.s32.totalorder %s19_s14, 4   ;;  %s1249_s10 = smov %s988_s11 }
 0x147   : > { %s1250_s11 = smov %s1123_s15  ;;  %s1251_s12 = smov %s996_s13 }
 0x148   : > { %s1252_s13 = smov %s1254_s25  ;;  %18 = sbr.rel (!%p16_p3) target bundleno = 7 (0x7), region = 78 }
 0x14d   :  { %493 = vsyncpa [#allocation3], 1 }
 0x14e   :  { %495 = vsyncpa [#allocation3 + $0x1], 1 }
 0x14f   :  { %496 = vsyncpa [#allocation6], 1 }
 0x150   :  { %497 = vsyncpa [#allocation4], 1 }
 0x151   :  { %499 = vsyncpa [#allocation4 + $0x1], 1 }

</bundles_post_ra>
